<compile_context>
chip_gen: v7x
topology: tpu7x:2x2x1
jax: 0.10.0
libtpu: 0.0.40
codegen_flags: <defaults>
</compile_context>

<pallas_src>
import functools
import math

import jax
import jax.numpy as jnp
from jax.experimental import pallas as pl
from jax.experimental.pallas import tpu as pltpu

EPS = 1e-12       # OpenUnmix input-affine epsilon
BN_EPS = 1e-5     # PyTorch BatchNorm1d default eps

# tile caps (sized so 2x double-buffered bf16 tiles stay far under 32 MiB on every TPU gen)
_TM, _TN, _TK = 256, 512, 512
_VMEM_LIMIT = 32 * 1024 * 1024


def _round_up(n, m):
    return ((n + m - 1) // m) * m


def _pick_div(dim, cap, align):
    """Largest tile <= cap (multiple of `align`) dividing `dim` (dim is a multiple of align)."""
    if dim <= cap:
        return dim
    t = cap
    while t >= align:
        if dim % t == 0:
            return t
        t -= align
    return align


# ----------------------------- Pallas kernels -----------------------------

def _linear_kernel(x_ref, w_ref, s_ref, b_ref, o_ref, acc_ref, *, act):
    """Tiled y = act((x @ w) * s + b); grid = (D, Mt, Nt, Kt), f32 accumulator in VMEM."""
    k = pl.program_id(3)

    @pl.when(k == 0)
    def _():
        acc_ref[...] = jnp.zeros_like(acc_ref)

    acc_ref[...] += jnp.dot(x_ref[0], w_ref[0], preferred_element_type=jnp.float32)

    @pl.when(k == pl.num_programs(3) - 1)
    def _():
        y = acc_ref[...] * s_ref[0] + b_ref[0]          # folded BN (eval) / LSTM biases
        if act == "tanh":
            y = jnp.tanh(y)
        elif act == "relu":
            y = jnp.maximum(y, 0.0)
        o_ref[0] = y.astype(o_ref.dtype)


def _linear_mask_kernel(x_ref, w_ref, s_ref, b_ref, os_ref, ob_ref, mix_ref, o_ref, acc_ref):
    """fc3 + folded BN + output affine + ReLU + mixture masking fused into the matmul epilogue."""
    k = pl.program_id(3)

    @pl.when(k == 0)
    def _():
        acc_ref[...] = jnp.zeros_like(acc_ref)

    acc_ref[...] += jnp.dot(x_ref[0], w_ref[0], preferred_element_type=jnp.float32)

    @pl.when(k == pl.num_programs(3) - 1)
    def _():
        y = acc_ref[...] * s_ref[0] + b_ref[0]                # folded BatchNorm (eval)
        y = jnp.maximum(y * os_ref[0] + ob_ref[0], 0.0)       # output affine + ReLU
        o_ref[0] = (y * mix_ref[0]).astype(o_ref.dtype)       # mask the mixture amplitude


def _lstm_kernel(gx_ref, whh_ref, ho_ref, h_scr, c_scr, *, tb):
    """LSTM recurrence, both directions batched on a leading axis, `tb` timesteps per grid step."""
    @pl.when(pl.program_id(0) == 0)
    def _():
        h_scr[...] = jnp.zeros_like(h_scr)
        c_scr[...] = jnp.zeros_like(c_scr)

    H = h_scr.shape[-1]
    whh = whh_ref[...]                                        # (D, H, 4H) bf16, VMEM-resident
    # Fully unrolled inner time loop (static trip count == lax.fori_loop(..., unroll=True)).
    for j in range(tb):
        h = h_scr[...]
        gates = gx_ref[:, j] + jnp.einsum(
            "dbh,dhg->dbg", h.astype(jnp.bfloat16), whh,
            preferred_element_type=jnp.float32)
        # PyTorch LSTM gate order: i, f, g, o
        i_g = jax.nn.sigmoid(gates[..., 0:H])
        f_g = jax.nn.sigmoid(gates[..., H:2 * H])
        g_g = jnp.tanh(gates[..., 2 * H:3 * H])
        o_g = jax.nn.sigmoid(gates[..., 3 * H:4 * H])
        c = f_g * c_scr[...] + i_g * g_g
        h_new = o_g * jnp.tanh(c)
        c_scr[...] = c
        h_scr[...] = h_new
        ho_ref[:, j] = h_new.astype(ho_ref.dtype)


# ----------------------------- kernel wrappers -----------------------------

def batched_linear(x, w_t, s, b, n_out, act):
    """x: (D, M, K) float; w_t: (D, Kp, Np) bf16 (pre-transposed / padded); s,b: (D,1,Np) f32."""
    D, M, K = x.shape
    _, Kp, Np = w_t.shape
    tm = min(_TM, _round_up(M, 8))
    Mp = _round_up(M, tm)
    tk = _pick_div(Kp, _TK, 128)
    tn = _pick_div(Np, _TN, 128)
    xp = jnp.pad(x.astype(jnp.bfloat16), ((0, 0), (0, Mp - M), (0, Kp - K)))
    out = pl.pallas_call(
        functools.partial(_linear_kernel, act=act),
        out_shape=jax.ShapeDtypeStruct((D, Mp, Np), jnp.float32),
        grid=(D, Mp // tm, Np // tn, Kp // tk),
        in_specs=[
            pl.BlockSpec((1, tm, tk), lambda d, m, n, k: (d, m, k)),
            pl.BlockSpec((1, tk, tn), lambda d, m, n, k: (d, k, n)),
            pl.BlockSpec((1, 1, tn), lambda d, m, n, k: (d, 0, n)),
            pl.BlockSpec((1, 1, tn), lambda d, m, n, k: (d, 0, n)),
        ],
        out_specs=pl.BlockSpec((1, tm, tn), lambda d, m, n, k: (d, m, n)),
        scratch_shapes=[pltpu.VMEM((tm, tn), jnp.float32)],
        compiler_params=pltpu.CompilerParams(
            dimension_semantics=("parallel", "parallel", "parallel", "arbitrary"),
            vmem_limit_bytes=_VMEM_LIMIT),
    )(xp, w_t, s, b)
    return out[:, :M, :n_out]


def batched_linear_masked(x, w_t, s, b, out_scale, out_bias, mix, n_out):
    """Same as batched_linear but with fused output affine + ReLU + mixture masking epilogue."""
    D, M, K = x.shape
    _, Kp, Np = w_t.shape
    tm = min(_TM, _round_up(M, 8))
    Mp = _round_up(M, tm)
    tk = _pick_div(Kp, _TK, 128)
    tn = _pick_div(Np, _TN, 128)
    xp = jnp.pad(x.astype(jnp.bfloat16), ((0, 0), (0, Mp - M), (0, Kp - K)))
    mixp = jnp.pad(mix[None], ((0, 0), (0, Mp - M), (0, Np - n_out)))
    out = pl.pallas_call(
        _linear_mask_kernel,
        out_shape=jax.ShapeDtypeStruct((D, Mp, Np), jnp.float32),
        grid=(D, Mp // tm, Np // tn, Kp // tk),
        in_specs=[
            pl.BlockSpec((1, tm, tk), lambda d, m, n, k: (d, m, k)),
            pl.BlockSpec((1, tk, tn), lambda d, m, n, k: (d, k, n)),
            pl.BlockSpec((1, 1, tn), lambda d, m, n, k: (d, 0, n)),
            pl.BlockSpec((1, 1, tn), lambda d, m, n, k: (d, 0, n)),
            pl.BlockSpec((1, 1, tn), lambda d, m, n, k: (d, 0, n)),
            pl.BlockSpec((1, 1, tn), lambda d, m, n, k: (d, 0, n)),
            pl.BlockSpec((1, tm, tn), lambda d, m, n, k: (0, m, n)),
        ],
        out_specs=pl.BlockSpec((1, tm, tn), lambda d, m, n, k: (d, m, n)),
        scratch_shapes=[pltpu.VMEM((tm, tn), jnp.float32)],
        compiler_params=pltpu.CompilerParams(
            dimension_semantics=("parallel", "parallel", "parallel", "arbitrary"),
            vmem_limit_bytes=_VMEM_LIMIT),
    )(xp, w_t, s, b, out_scale, out_bias, mixp)
    return out[:, :M, :n_out]


def lstm_scan(gx, whh_t, tb=8):
    """gx: (D, T, B, 4H) f32 (D = both directions), whh_t: (D, H, 4H) bf16 -> (D, T, B, H)."""
    D, T, B, G = gx.shape
    H = G // 4
    tb = min(tb, T)
    Tp = _round_up(T, tb)
    if Tp != T:
        # zero-padded trailing steps only pollute state AFTER all real outputs -> safe to discard
        gx = jnp.pad(gx, ((0, 0), (0, Tp - T), (0, 0), (0, 0)))
    out = pl.pallas_call(
        functools.partial(_lstm_kernel, tb=tb),
        out_shape=jax.ShapeDtypeStruct((D, Tp, B, H), jnp.float32),
        grid=(Tp // tb,),
        in_specs=[
            pl.BlockSpec((D, tb, B, G), lambda t: (0, t, 0, 0)),
            pl.BlockSpec((D, H, G), lambda t: (0, 0, 0)),
        ],
        out_specs=pl.BlockSpec((D, tb, B, H), lambda t: (0, t, 0, 0)),
        scratch_shapes=[pltpu.VMEM((D, B, H), jnp.float32),
                        pltpu.VMEM((D, B, H), jnp.float32)],
        compiler_params=pltpu.CompilerParams(dimension_semantics=("arbitrary",)),
    )(gx, whh_t)
    return out[:, :T]


# ----------------------------- model forward (glue) -----------------------------

def lstm_forward(x_slab, layers, T, B):
    """Bidirectional multi-layer LSTM, batch_first, eval mode. x_slab: (T*B, feat) time-major."""
    x = x_slab
    for lp in layers:
        H = lp["rnn_hidden"]
        xb = jnp.flip(x.reshape(T, B, -1), axis=0).reshape(T * B, -1)
        xd = jnp.stack([x, xb], axis=0)                                    # (2, T*B, in)
        gx = batched_linear(xd, lp["wih_t"], lp["gx_scale"], lp["gx_shift"],
                            n_out=4 * H, act="none")                       # (2, T*B, 4H)
        gx = gx.reshape(2, T, B, 4 * H)
        h = lstm_scan(gx, lp["whh_t"])                                     # (2, T, B, H)
        hf, hb = h[0], jnp.flip(h[1], axis=0)
        x = jnp.concatenate([hf, hb], axis=-1).reshape(T * B, 2 * H)
    return x
    # TODO(synk): training-mode inter-layer dropout (p=0.4) intentionally omitted (eval forward).


def openunmix_forward(p, amp):
    """OpenUnmix spectrogram model: amp (B, C, n_bins, F) -> estimated amplitude, same shape."""
    B, C, nb, F = amp.shape
    max_bin, hidden = p["max_bin"], p["hidden"]

    # crop to valid bins + input affine (scale=1 / bias=0 after _reset_parameters)
    xv = amp[:, :, :max_bin, :]
    x_aff = (xv - p["bias_in"][None, None, :, None]) / (
        jnp.abs(p["scale_in"])[None, None, :, None] + EPS)
    # TODO(synk): verify exact input-affine convention of the reference repo (numerically
    # identical here since _reset_parameters gives scale=1, bias=0).

    # time-major slab (rows ordered (frame, batch)) so LSTM gx linears need no transpose
    x_slab = jnp.transpose(x_aff, (3, 0, 1, 2)).reshape(F * B, C * max_bin)

    # fc1 + BN1 (folded) + tanh
    h_seq = batched_linear(x_slab[None], p["w1_t"], p["bn1_s"], p["bn1_b"],
                           n_out=hidden, act="tanh")[0]                    # (F*B, hidden)

    # bidirectional LSTM stack (both directions fused in one scan per layer)
    x_rnn = lstm_forward(h_seq, p["lstm"], F, B)                           # (F*B, hidden)

    # skip concat + fc2 + BN2 + relu
    h2 = jnp.concatenate([h_seq, x_rnn], axis=-1)                          # (F*B, 2*hidden)
    h3 = batched_linear(h2[None], p["w2_t"], p["bn2_s"], p["bn2_b"],
                        n_out=hidden, act="relu")[0]                       # (F*B, hidden)

    # fc3 + BN3 + output affine + relu + mixture masking, fused in one kernel epilogue
    mix_slab = jnp.transpose(amp, (3, 0, 1, 2)).reshape(F * B, C * nb)
    est_slab = batched_linear_masked(h3[None], p["w3_t"], p["bn3_s"], p["bn3_b"],
                                     p["out_scale_cols"], p["out_bias_cols"],
                                     mix_slab, n_out=C * nb)[0]            # (F*B, C*nb)

    return est_slab.reshape(F, B, C, nb).transpose(1, 2, 3, 0)             # (B, C, nb, F)


# ----------------------------- STFT / ISTFT (jnp.fft; no Pallas FFT primitive) ----------------

def hann_window(n_fft):
    n = jnp.arange(n_fft, dtype=jnp.float32)
    return 0.5 - 0.5 * jnp.cos(2.0 * jnp.pi * n / n_fft)


def stft(x, n_fft, hop, window):
    """x: (B, C, T) -> complex (B, C, n_bins, n_frames); center=True, reflect pad (torch defaults)."""
    pad = n_fft // 2
    xp = jnp.pad(x, ((0, 0), (0, 0), (pad, pad)), mode="reflect")
    n_frames = 1 + (xp.shape[-1] - n_fft) // hop
    idx = jnp.arange(n_frames)[:, None] * hop + jnp.arange(n_fft)[None, :]
    frames = xp[..., idx] * window                                         # (B, C, F, n_fft)
    spec = jnp.fft.rfft(frames, axis=-1)                                   # (B, C, F, n_bins)
    return jnp.swapaxes(spec, -1, -2)                                      # (B, C, n_bins, F)


def istft(spec, n_fft, hop, window, length):
    """Inverse of `stft` (overlap-add with window-square normalization), cropped to `length`."""
    frames = jnp.fft.irfft(jnp.swapaxes(spec, -1, -2), n=n_fft, axis=-1) * window
    B, C, F, _ = frames.shape
    out_len = n_fft + hop * (F - 1)
    idx = jnp.arange(F)[:, None] * hop + jnp.arange(n_fft)[None, :]
    y = jnp.zeros((B, C, out_len), frames.dtype).at[..., idx].add(frames)
    wsq = jnp.zeros((out_len,), jnp.float32).at[idx].add(
        jnp.broadcast_to(window ** 2, idx.shape))
    y = y / jnp.where(wsq > 1e-11, wsq, 1.0)
    pad = n_fft // 2
    return y[..., pad:pad + length]


def openunmix_time_forward(p, x):
    """OpenUnmixTimeDomainWrapper.forward: (B, in_channels, T) -> (B, in_channels, T)."""
    assert x.ndim == 3, "input is expected 3D input."
    T = x.shape[-1]
    window = p["window"]
    spec = stft(x, p["n_fft"], p["hop_length"], window)
    amp, angle = jnp.abs(spec), jnp.angle(spec)
    est_amp = openunmix_forward(p, amp)
    est_spec = est_amp * jnp.exp(1j * angle)
    return istft(est_spec, p["n_fft"], p["hop_length"], window, length=T)


# ----------------------------- deterministic parameter init -----------------------------

def _dense(key, shape, fan_in):
    return jax.random.normal(key, shape, jnp.float32) / math.sqrt(fan_in)


def _bn_fold(key, n):
    """Eval-mode BatchNorm1d folded into (scale, shift) with PyTorch's default eps."""
    k1, k2, k3, k4 = jax.random.split(key, 4)
    gamma = 1.0 + 0.05 * jax.random.normal(k1, (n,), jnp.float32)
    beta = 0.05 * jax.random.normal(k2, (n,), jnp.float32)
    mean = 0.05 * jax.random.normal(k3, (n,), jnp.float32)
    var = 1.0 + 0.1 * jax.random.uniform(k4, (n,), jnp.float32)
    scale = gamma / jnp.sqrt(var + BN_EPS)
    shift = beta - mean * scale
    return scale, shift


def _pad_cols(v, np_):
    return jnp.pad(v, (0, np_ - v.shape[0])).reshape(1, 1, np_).astype(jnp.float32)


def _pad_wt(w, kp, np_):
    """(n_out, n_in) torch-layout weight -> (kp, np_) transposed / zero-padded / bf16."""
    wt = w.T
    wt = jnp.pad(wt, ((0, kp - wt.shape[0]), (0, np_ - wt.shape[1])))
    return wt.astype(jnp.bfloat16)


def init_openunmix_params(key, in_channels, hidden, num_layers, n_bins, max_bin, n_fft, hop_length):
    """Random (deterministic) weights in PyTorch layout; all transposes / pads / bf16 casts and
    BatchNorm folds are precomputed here so the forward path never re-prepares weights."""
    rnn_hidden = hidden // 2
    in_feat = in_channels * max_bin
    out_feat = in_channels * n_bins
    ks = iter(jax.random.split(key, 8 + 8 * num_layers))

    p = {
        "n_fft": n_fft, "hop_length": hop_length, "window": hann_window(n_fft),
        "max_bin": max_bin, "hidden": hidden,
        # _reset_parameters(): scale=1, bias=0
        "scale_in": jnp.ones((max_bin,), jnp.float32),
        "bias_in": jnp.zeros((max_bin,), jnp.float32),
    }
    scale_out = jnp.ones((n_bins,), jnp.float32)
    bias_out = jnp.zeros((n_bins,), jnp.float32)

    kp1, np1 = _round_up(in_feat, 128), _round_up(hidden, 128)
    w1 = _dense(next(ks), (hidden, in_feat), in_feat)
    s1, b1 = _bn_fold(next(ks), hidden)
    p["w1_t"] = _pad_wt(w1, kp1, np1)[None]
    p["bn1_s"], p["bn1_b"] = _pad_cols(s1, np1), _pad_cols(b1, np1)

    kp2, np2 = _round_up(2 * hidden, 128), _round_up(hidden, 128)
    w2 = _dense(next(ks), (hidden, 2 * hidden), 2 * hidden)
    s2, b2 = _bn_fold(next(ks), hidden)
    p["w2_t"] = _pad_wt(w2, kp2, np2)[None]
    p["bn2_s"], p["bn2_b"] = _pad_cols(s2, np2), _pad_cols(b2, np2)

    kp3, np3 = _round_up(hidden, 128), _round_up(out_feat, 128)
    w3 = _dense(next(ks), (out_feat, hidden), hidden)
    s3, b3 = _bn_fold(next(ks), out_feat)
    p["w3_t"] = _pad_wt(w3, kp3, np3)[None]
    p["bn3_s"], p["bn3_b"] = _pad_cols(s3, np3), _pad_cols(b3, np3)
    # per-output-column affine for the fused mask epilogue (per-bin scale/bias tiled over channels)
    p["out_scale_cols"] = _pad_cols(jnp.tile(scale_out, in_channels), np3)
    p["out_bias_cols"] = _pad_cols(jnp.tile(bias_out, in_channels), np3)

    # LSTM: both directions stacked so one tiled linear + one scan serve each layer
    G = 4 * rnn_hidden
    layers = []
    for _ in range(num_layers):
        in_size = hidden          # bidirectional: 2*rnn_hidden == hidden on every layer
        kpl, gpl = _round_up(in_size, 128), _round_up(G, 128)
        wih_t, whh_t, gbias = [], [], []
        for _d in range(2):
            wih = _dense(next(ks), (G, in_size), rnn_hidden)
            whh = _dense(next(ks), (G, rnn_hidden), rnn_hidden)
            bih = 0.1 * jax.random.normal(next(ks), (G,), jnp.float32)
            bhh = 0.1 * jax.random.normal(next(ks), (G,), jnp.float32)
            wih_t.append(_pad_wt(wih, kpl, gpl))
            whh_t.append(whh.T.astype(jnp.bfloat16))
            gbias.append(jnp.pad(bih + bhh, (0, gpl - G)))
        layers.append({
            "rnn_hidden": rnn_hidden,
            "wih_t": jnp.stack(wih_t, axis=0),                             # (2, Kp, 4Hp) bf16
            "whh_t": jnp.stack(whh_t, axis=0),                             # (2, H, 4H) bf16
            "gx_scale": jnp.ones((2, 1, gpl), jnp.float32),
            "gx_shift": jnp.stack(gbias, axis=0).reshape(2, 1, gpl).astype(jnp.float32),
        })
    p["lstm"] = layers
    return p


# ----------------------------- demo -----------------------------

if __name__ == "__main__":
    key = jax.random.PRNGKey(0)

    # Small but shape-consistent config
    B, C = 2, 2                  # batch, in_channels
    n_fft, hop = 32, 8           # STFT params -> n_bins = 17
    T = 64                       # time samples -> n_frames = 9
    n_bins = n_fft // 2 + 1
    max_bin = 12                 # exercise the max_bin < n_bins split
    hidden = 32                  # hidden_channels (rnn_hidden = 16, bidirectional)
    num_layers = 2

    k_in, k_model = jax.random.split(key)
    x = jax.random.normal(k_in, (B, C, T), jnp.float32)     # time-domain mixture

    params = init_openunmix_params(k_model, C, hidden, num_layers, n_bins, max_bin, n_fft, hop)

    out = openunmix_time_forward(params, x)
    out = jax.block_until_ready(out)

    assert out.shape == (B, C, T), out.shape
    assert bool(jnp.all(jnp.isfinite(out)))
    print("KERNEL_OK")
</pallas_src>

<mosaic_0001>
module attributes {stable_mosaic.version = 11 : i64} {
  func.func @_linear_kernel(%arg0: i32, %arg1: i32, %arg2: i32, %arg3: i32, %arg4: memref<1x24x128xbf16, #tpu.memory_space<vmem>>, %arg5: memref<1x128x128xbf16, #tpu.memory_space<vmem>>, %arg6: memref<1x1x128xf32, #tpu.memory_space<vmem>>, %arg7: memref<1x1x128xf32, #tpu.memory_space<vmem>>, %arg8: memref<1x24x128xf32, #tpu.memory_space<vmem>>, %arg9: memref<24x128xf32, #tpu.memory_space<vmem>>) attributes {dimension_semantics = [#tpu.dimension_semantics<parallel>, #tpu.dimension_semantics<parallel>, #tpu.dimension_semantics<parallel>, #tpu.dimension_semantics<arbitrary>], iteration_bounds = array<i64: 1, 1, 1, 1>, scalar_prefetch = 0 : i64, scratch_operands = 1 : i64, tpu.core_type = #tpu.core_type<tc>, window_params = [{transform_indices = @transform_0, window_bounds = array<i64: 1, 24, 128>}, {transform_indices = @transform_1, window_bounds = array<i64: 1, 128, 128>}, {transform_indices = @transform_2, window_bounds = array<i64: 1, 1, 128>}, {transform_indices = @transform_3, window_bounds = array<i64: 1, 1, 128>}, {transform_indices = @transform_4, window_bounds = array<i64: 1, 24, 128>}]} {
    %c0_i32 = arith.constant 0 : i32
    %0 = arith.cmpi eq, %arg3, %c0_i32 : i32
    %1 = arith.extui %0 : i1 to i32
    %c0_i32_0 = arith.constant 0 : i32
    %2 = arith.cmpi ne, %1, %c0_i32_0 : i32
    scf.if %2 {
      %cst_12 = arith.constant 0.000000e+00 : f32
      %14 = vector.broadcast %cst_12 : f32 to vector<24x128xf32>
      %c0_13 = arith.constant 0 : index
      %c0_14 = arith.constant 0 : index
      %15 = vector.load %arg9[%c0_13, %c0_14] : memref<24x128xf32, #tpu.memory_space<vmem>>, vector<24x128xf32>
      tpu.vector_store %arg9[%c0_13, %c0_14], %14 {strides = array<i32>} : memref<24x128xf32, #tpu.memory_space<vmem>>, vector<24x128xf32>,
    } else {
    }
    %c0 = arith.constant 0 : index
    %c0_1 = arith.constant 0 : index
    %3 = vector.load %arg9[%c0, %c0_1] : memref<24x128xf32, #tpu.memory_space<vmem>>, vector<24x128xf32>
    %c0_2 = arith.constant 0 : index
    %c0_3 = arith.constant 0 : index
    %c0_4 = arith.constant 0 : index
    %4 = vector.load %arg4[%c0_2, %c0_3, %c0_4] : memref<1x24x128xbf16, #tpu.memory_space<vmem>>, vector<1x24x128xbf16>
    %5 = vector.shape_cast %4 : vector<1x24x128xbf16> to vector<24x128xbf16>
    %c0_5 = arith.constant 0 : index
    %c0_6 = arith.constant 0 : index
    %c0_7 = arith.constant 0 : index
    %6 = vector.load %arg5[%c0_5, %c0_6, %c0_7] : memref<1x128x128xbf16, #tpu.memory_space<vmem>>, vector<1x128x128xbf16>
    %7 = vector.shape_cast %6 : vector<1x128x128xbf16> to vector<128x128xbf16>
    %cst = arith.constant dense<0.000000e+00> : vector<24x128xf32>
    %8 = tpu.matmul %5, %7, %cst {dimension_numbers = #tpu.dot_dimension_numbers<[1], [0], [0], [1], [0, 0, 1, 1], [], []>} : vector<24x128xbf16>, vector<128x128xbf16>, vector<24x128xf32> -> vector<24x128xf32>
    %9 = arith.addf %3, %8 : vector<24x128xf32>
    %c0_8 = arith.constant 0 : index
    %c0_9 = arith.constant 0 : index
    %10 = vector.load %arg9[%c0_8, %c0_9] : memref<24x128xf32, #tpu.memory_space<vmem>>, vector<24x128xf32>
    tpu.vector_store %arg9[%c0_8, %c0_9], %9 {strides = array<i32>} : memref<24x128xf32, #tpu.memory_space<vmem>>, vector<24x128xf32>,
    %c0_i32_10 = arith.constant 0 : i32
    %11 = arith.cmpi eq, %arg3, %c0_i32_10 : i32
    %12 = arith.extui %11 : i1 to i32
    %c0_i32_11 = arith.constant 0 : i32
    %13 = arith.cmpi ne, %12, %c0_i32_11 : i32
    scf.if %13 {
      %c0_12 = arith.constant 0 : index
      %c0_13 = arith.constant 0 : index
      %14 = vector.load %arg9[%c0_12, %c0_13] : memref<24x128xf32, #tpu.memory_space<vmem>>, vector<24x128xf32>
      %c0_14 = arith.constant 0 : index
      %c0_15 = arith.constant 0 : index
      %c0_16 = arith.constant 0 : index
      %15 = vector.load %arg6[%c0_14, %c0_15, %c0_16] : memref<1x1x128xf32, #tpu.memory_space<vmem>>, vector<1x1x128xf32>
      %16 = vector.shape_cast %15 : vector<1x1x128xf32> to vector<1x128xf32>
      %17 = vector.broadcast %16 : vector<1x128xf32> to vector<24x128xf32>
      %18 = arith.mulf %14, %17 : vector<24x128xf32>
      %c0_17 = arith.constant 0 : index
      %c0_18 = arith.constant 0 : index
      %c0_19 = arith.constant 0 : index
      %19 = vector.load %arg7[%c0_17, %c0_18, %c0_19] : memref<1x1x128xf32, #tpu.memory_space<vmem>>, vector<1x1x128xf32>
      %20 = vector.shape_cast %19 : vector<1x1x128xf32> to vector<1x128xf32>
      %21 = vector.broadcast %20 : vector<1x128xf32> to vector<24x128xf32>
      %22 = arith.addf %18, %21 : vector<24x128xf32>
      %23 = math.tanh %22 : vector<24x128xf32>
      %c0_20 = arith.constant 0 : index
      %c0_21 = arith.constant 0 : index
      %c0_22 = arith.constant 0 : index
      %24 = vector.load %arg8[%c0_20, %c0_21, %c0_22] : memref<1x24x128xf32, #tpu.memory_space<vmem>>, vector<1x24x128xf32>
      %25 = vector.shape_cast %24 : vector<1x24x128xf32> to vector<24x128xf32>
      %26 = vector.shape_cast %23 : vector<24x128xf32> to vector<1x24x128xf32>
      tpu.vector_store %arg8[%c0_20, %c0_21, %c0_22], %26 {strides = array<i32>} : memref<1x24x128xf32, #tpu.memory_space<vmem>>, vector<1x24x128xf32>,
    } else {
    }
    return
  }
  func.func @transform_0(%arg0: i32, %arg1: i32, %arg2: i32, %arg3: i32) -> (i32, i32, i32) {
    %c0_i32 = arith.constant 0 : i32
    return %arg0, %arg1, %arg3 : i32, i32, i32
  }
  func.func @transform_1(%arg0: i32, %arg1: i32, %arg2: i32, %arg3: i32) -> (i32, i32, i32) {
    %c0_i32 = arith.constant 0 : i32
    return %arg0, %arg3, %arg2 : i32, i32, i32
  }
  func.func @transform_2(%arg0: i32, %arg1: i32, %arg2: i32, %arg3: i32) -> (i32, i32, i32) {
    %c0_i32 = arith.constant 0 : i32
    %c0_i32_0 = arith.constant 0 : i32
    return %arg0, %c0_i32, %arg2 : i32, i32, i32
  }
  func.func @transform_3(%arg0: i32, %arg1: i32, %arg2: i32, %arg3: i32) -> (i32, i32, i32) {
    %c0_i32 = arith.constant 0 : i32
    %c0_i32_0 = arith.constant 0 : i32
    return %arg0, %c0_i32, %arg2 : i32, i32, i32
  }
  func.func @transform_4(%arg0: i32, %arg1: i32, %arg2: i32, %arg3: i32) -> (i32, i32, i32) {
    %c0_i32 = arith.constant 0 : i32
    return %arg0, %arg1, %arg2 : i32, i32, i32
  }
}

</mosaic_0001>

<bundles_post_ra>
// kernel: tpu_custom_call.1
= control target key start
LH: loop header
LB: loop body
LE: loop exit
PB: predicated region body
PF: predicated region fallthrough
CT: control target
= control target key end

     0   :  { %9 = vsyncpa [#allocation4], 0  ;;  %s449_s0 = inlined_call_operand.hbm [shape: bf16[1,24,128], index: 0, kind: input, shape index: {}]   ;;  %s450_s1 = inlined_call_operand.hbm [shape: bf16[1,128,128], index: 1, kind: input, shape index: {}]   ;;  %s451_s2 = inlined_call_operand.vmem [shape: f32[1,1,128], index: 2, kind: input, shape index: {}]   ;;  %s452_s3 = inlined_call_operand.vmem [shape: f32[1,1,128], index: 3, kind: input, shape index: {}]   ;;  %s453_s4 = inlined_call_operand.hbm [shape: f32[1,24,128], index: 4, kind: output, shape index: {}]  }
   0x1   :  { %10 = vsyncpa [#allocation7], 0 }
   0x2   :  { %11 = vsyncpa [#allocation5], 0  ;;  %s375_s15 = smov [#allocation3]   ;;  %s303_s19 = scalar_lea.hbm %s449_s0, 192 }
   0x3   :  { %s17_s16 = sshll.u32 %s375_s15, 4  ;;  %p304_p0 = scmp.ne.s32.totalorder %s449_s0, %s303_s19  ;;  %s18_s16 = int_to_ptr.vmem [resolvable:$true] %s17_s16 }
   0x4   :  { %p307_p1 = scmp.lt.u32.totalorder %s303_s19, %s449_s0 }
   0x6   :  { %p309_p2 = pnand %p307_p1, %p304_p0 }
   0x8   :  { %312 = shalt.err (!%p309_p2)
}
   0x9   :  { %s313_s24 = scalar_lea.vmem %s18_s16, 192  ;;  %p318_p4 = scmp.lt.s32.totalorder %s18_s16, %s18_s16 }
   0xa   :  { %p314_p3 = scmp.ne.s32.totalorder %s18_s16, %s313_s24  ;;  %p319_p5 = scmp.lt.s32.totalorder %s313_s24, %s313_s24 }
   0xc   :  { %p320_p6 = por %p319_p5, %p318_p4 }
   0xe   :  { %p321_p7 = pnand %p320_p6, %p314_p3 }
  0x10   :  { %324 = shalt.err (!%p321_p7)
}
  0x11   :  { %s376_s25 = smov 64   ;;  %s377_s26 = smov 4  }
  0x12   :  { %23 = dma.hbm_to_vmem [thread:$0]  %s449_s0, 192, %s18_s16, [#allocation4], %s376_s25, %s376_s25, %s377_s26  }
  0x13   :  { %s378_s29 = smov [#allocation6]   ;;  %s325_s7 = scalar_lea.hbm %s450_s1, 1024 }
  0x14   :  { %s29_s30 = sshll.u32 %s378_s29, 4  ;;  %p326_p8 = scmp.ne.s32.totalorder %s450_s1, %s325_s7  ;;  %s30_s30 = int_to_ptr.vmem [resolvable:$true] %s29_s30 }
  0x15   :  { %p329_p9 = scmp.lt.u32.totalorder %s325_s7, %s450_s1 }
  0x17   :  { %p331_p10 = pnand %p329_p9, %p326_p8 }
  0x19   :  { %334 = shalt.err (!%p331_p10)
}
  0x1a   :  { %s335_s12 = scalar_lea.vmem %s30_s30, 1024  ;;  %p340_p12 = scmp.lt.s32.totalorder %s30_s30, %s30_s30 }
  0x1b   :  { %p336_p11 = scmp.ne.s32.totalorder %s30_s30, %s335_s12  ;;  %p341_p13 = scmp.lt.s32.totalorder %s335_s12, %s335_s12 }
  0x1d   :  { %p342_p0 = por %p341_p13, %p340_p12 }
  0x1f   :  { %p343_p1 = pnand %p342_p0, %p336_p11 }
  0x21   :  { %346 = shalt.err (!%p343_p1)
}
  0x22   :  { %35 = dma.hbm_to_vmem [thread:$0]  %s450_s1, 1024, %s30_s30, [#allocation7], %s376_s25, %s376_s25, %s377_s26  }
  0x23   :  { %369 = dma.done.wait [#allocation4], 192  }
  0x24   :  { %370 = vsyncadd [#allocation4], 4294967104 }
  0x25   :  { %371 = dma.done.wait [#allocation7], 1024  }
  0x26   :  { %372 = vsyncadd [#allocation7], 4294966272  ;;  %v287_v0 = vld [vmem:[#allocation6] sm:$0xff]   ;;  %v288_v1 = vld [vmem:[#allocation6 + $0x8] sm:$0xff]   ;;  %s379_s17 = smov [#allocation8]  }
  0x27   :  { %260 = vmatprep.subr.bf16.mxu0 %v287_v0  ;;  %v289_v2 = vld [vmem:[#allocation6 + $0x10] sm:$0xff]   ;;  %v290_v3 = vld [vmem:[#allocation6 + $0x18] sm:$0xff]   ;;  %v291_v5 = vld [vmem:[#allocation6 + $0x20] sm:$0xff]   ;;  %s225_s18 = sshll.u32 %s379_s17, 4  ;;  %s226_s18 = int_to_ptr.vmem [resolvable:$true] %s225_s18 }
  0x28   :  { %261 = vmatpush3.bf16.msra.mxu0 %v287_v0  ;;  %v295_v4 = vld [vmem:[#allocation3] sm:$0xff]   ;;  %v292_v6 = vld [vmem:[#allocation6 + $0x28] sm:$0xff]   ;;  %v296_v9 = vld [vmem:[#allocation3 + $0x8] ss:$0 sps:$4 sm:$0xff]   ;;  %p352_p3 = scmp.lt.s32.totalorder %s226_s18, %s226_s18 }
  0x29   :  { %262 = vmatprep.subr.bf16.mxu0 %v288_v1  ;;  %276 = vmatprep.mubr.bf16.mxu0 %v295_v4  ;;  %v293_v7 = vld [vmem:[#allocation6 + $0x30] sm:$0xff]   ;;  %v294_v8 = vld [vmem:[#allocation6 + $0x38] sm:$0xff]  }
  0x2a   :  { %v248_v10 = vld [vmem:[%s451_s2] ss:$0 sm:$0xff]  ;;  %s347_s2 = scalar_lea.vmem %s226_s18, 384 }
  0x2b   :  { %v249_v12 = vld [vmem:[%s452_s3] ss:$0 sm:$0xff]  ;;  %p348_p2 = scmp.ne.s32.totalorder %s226_s18, %s347_s2  ;;  %p353_p4 = scmp.lt.s32.totalorder %s347_s2, %s347_s2 }
  0x2c   :  { %263 = vmatpush3.bf16.msra.mxu0 %v288_v1 }
  0x2d   :  { %264 = vmatprep.subr.bf16.mxu0 %v289_v2  ;;  %p354_p5 = por %p353_p4, %p352_p3 }
  0x2f   :  { %p355_p6 = pnand %p354_p5, %p348_p2 }
  0x30   :  { %265 = vmatpush3.bf16.msra.mxu0 %v289_v2 }
  0x31   :  { %266 = vmatprep.subr.bf16.mxu0 %v290_v3 }
  0x34   :  { %267 = vmatpush3.bf16.msra.mxu0 %v290_v3 }
  0x35   :  { %268 = vmatprep.subr.bf16.mxu0 %v291_v5 }
  0x38   :  { %269 = vmatpush3.bf16.msra.mxu0 %v291_v5 }
  0x39   :  { %270 = vmatprep.subr.bf16.mxu0 %v292_v6 }
  0x3c   :  { %271 = vmatpush3.bf16.msra.mxu0 %v292_v6 }
  0x3d   :  { %272 = vmatprep.subr.bf16.mxu0 %v293_v7 }
  0x40   :  { %273 = vmatpush3.bf16.msra.mxu0 %v293_v7 }
  0x41   :  { %274 = vmatprep.subr.bf16.mxu0 %v294_v8 }
  0x44   :  { %275 = vmatpush3.bf16.msra.mxu0 %v294_v8 }
  0x47   :  { %277 = vmatmul.mubr.bf16.vlgmr.msra.gmra.mrb[0].mxu0 %v296_v9 }
 0x11a   :  { %v278_v11 = vpop.f32.mrb[0].mxu0 }
 0x11b   :  { %v203_v13 = vmul.f32 %v278_v11, %v248_v10  ;;  %v168_v14 = vpop.f32.mrb[1].mxu0 }
 0x11c   :  { %v201_v15 = vmul.f32 %v248_v10, %v168_v14  ;;  %v279_v16 = vpop.f32.mrb[2].mxu0 }
 0x11d   :  { %v213_v17 = vadd.f32 %v249_v12, %v203_v13  ;;  %v171_v18 = vpop.f32.mrb[3].mxu0 }
 0x11e   :  { %v211_v19 = vadd.f32 %v249_v12, %v201_v15  ;;  %v202_v20 = vmul.f32 %v248_v10, %v171_v18 }
 0x11f   :  { %297 = vtanh.f32 %v213_v17 }
 0x120   :  { %299 = vtanh.f32 %v211_v19  ;;  %v212_v21 = vadd.f32 %v249_v12, %v202_v20 }
 0x122   :  { %301 = vtanh.f32 %v212_v21 }
 0x129   :  { %v298_v22 = vpop.eup %297 }
 0x12a   :  { %v300_v23 = vpop.eup %299  ;;  %219 = vst [vmem:[#allocation8 + $0x10] sm:$0xff] %v298_v22 }
 0x12b   :  { %217 = vst [vmem:[#allocation8] sm:$0xff] %v300_v23 }
 0x12c   :  { %v302_v24 = vpop.eup %301 }
 0x12d   :  { %218 = vst [vmem:[#allocation8 + $0x8] sm:$0xff] %v302_v24 }
 0x12e   :  { %358 = shalt.err (!%p355_p6)
}
 0x12f   :  { %s359_s20 = scalar_lea.hbm %s453_s4, 384 }
 0x130   :  { %p360_p7 = scmp.ne.s32.totalorder %s453_s4, %s359_s20  ;;  %p363_p8 = scmp.lt.u32.totalorder %s359_s20, %s453_s4 }
 0x132   :  { %p365_p9 = pnand %p363_p8, %p360_p7 }
 0x134   :  { %368 = shalt.err (!%p365_p9)
}
 0x135   :  { %s380_s25 = smov 128   ;;  %s381_s26 = smov 8  }
 0x136   :  { %231 = dma.vmem_to_hbm [thread:$0]  %s226_s18, 384, %s453_s4, [#allocation5], %s380_s25, %s380_s25, %s381_s26  }
 0x137   :  { %373 = dma.done.wait [#allocation5], 384  }
 0x138   :  { %374 = vsyncadd [#allocation5], 4294966912 }
 0x139   :  { %235 = vsyncpa [#allocation4], 1 }
 0x13a   :  { %236 = vsyncpa [#allocation7], 1 }
 0x13b   :  { %237 = vsyncpa [#allocation5], 1 }

</bundles_post_ra>
